<compile_context>
chip_gen: v7x
topology: tpu7x:2x2x1
jax: 0.10.0
libtpu: 0.0.40
codegen_flags: <defaults>
</compile_context>

<pallas_src>
import functools

import jax
import jax.numpy as jnp
import numpy as np
from jax import lax
from jax.experimental import pallas as pl
from jax.experimental.pallas import tpu as pltpu


def _round_up(a, b):
    return (a + b - 1) // b * b


def _triplet_kernel(x_ref, lf_ref, lab_row_ref, lab_col_ref, out_ref, *,
                    margin, n_valid, block_rows):
    TB = block_rows
    Np = x_ref.shape[0]
    D = x_ref.shape[1]

    i = pl.program_id(0)
    row0 = pl.multiple_of(i * TB, TB)

    # Resident full arrays (block index is constant -> DMA'd once).
    x_all = x_ref[...]                         # [Np, D]  native dtype (bf16/f32)
    lf_all = lf_ref[...]                       # [Np, L]
    lab_row = lab_row_ref[...]                 # [1, Np]  int32

    # This grid step's row block.
    x_blk = x_ref[pl.ds(row0, TB), :]          # [TB, D]
    lf_blk = lf_ref[pl.ds(row0, TB), :]        # [TB, L]
    lab_blk = lab_col_ref[pl.ds(row0, TB), :]  # [TB, 1] int32

    # ---- pairwise euclidean distances for this row block -------------------
    # Gram block on the MXU in the native dtype, f32 accumulation.
    gram = lax.dot_general(x_blk, x_all, (((1,), (1,)), ((), ())),
                           preferred_element_type=jnp.float32)        # [TB, Np]

    # Squared norms in f32 straight from x (no [N,N] eye/diag work).
    x_all32 = x_all.astype(jnp.float32)
    x_blk32 = x_blk.astype(jnp.float32)
    sq_blk = jnp.sum(x_blk32 * x_blk32, axis=1, keepdims=True)        # [TB, 1]
    # Row-form norms via a skinny matmul (avoids an in-kernel relayout).
    sq_row = lax.dot_general(jnp.ones((1, D), jnp.float32),
                             x_all32 * x_all32,
                             (((1,), (1,)), ((), ())),
                             preferred_element_type=jnp.float32)      # [1, Np]

    dist = jnp.sqrt(jnp.maximum(sq_blk + sq_row - 2.0 * gram, 1e-12))  # [TB, Np]

    # ---- hard example mining over all (valid) columns -----------------------
    col_i = lax.broadcasted_iota(jnp.int32, (TB, Np), 1)
    same = lab_blk == lab_row                                         # [TB, Np]
    if n_valid == Np:                       # no padding: trace-time fast path
        is_pos = same
        neg_excluded = same
    else:
        valid_col = col_i < n_valid
        is_pos = jnp.logical_and(same, valid_col)
        neg_excluded = jnp.logical_or(same, jnp.logical_not(valid_col))

    masked_pos = jnp.where(is_pos, dist, -jnp.inf)
    masked_neg = jnp.where(neg_excluded, jnp.inf, dist)
    dist_ap = jnp.max(masked_pos, axis=1, keepdims=True)              # [TB, 1]
    dist_an = jnp.min(masked_neg, axis=1, keepdims=True)              # [TB, 1]
    # first-occurrence arg{max,min} via the iota trick
    p_inds = jnp.min(jnp.where(masked_pos == dist_ap, col_i, Np),
                     axis=1, keepdims=True)                           # [TB, 1]
    n_inds = jnp.min(jnp.where(masked_neg == dist_an, col_i, Np),
                     axis=1, keepdims=True)                           # [TB, 1]

    # ---- fused one-hot gather of hard positive & negative local features ---
    inds = jnp.concatenate([p_inds, n_inds], axis=0)                  # [2TB, 1]
    col2 = lax.broadcasted_iota(jnp.int32, (2 * TB, Np), 1)
    onehot = (col2 == inds).astype(lf_all.dtype)                      # [2TB, Np]
    sel = jnp.dot(onehot, lf_all,
                  preferred_element_type=jnp.float32)                 # [2TB, L]

    lf_blk32 = lf_blk.astype(jnp.float32)
    dp = lf_blk32 - sel[:TB, :]
    dn = lf_blk32 - sel[TB:, :]
    local_ap = jnp.sqrt(jnp.maximum(jnp.sum(dp * dp, axis=1, keepdims=True),
                                    1e-12))
    local_an = jnp.sqrt(jnp.maximum(jnp.sum(dn * dn, axis=1, keepdims=True),
                                    1e-12))

    # ---- MarginRankingLoss (y=1): partial sums; wrapper divides by true N ---
    g = jnp.maximum(dist_ap - dist_an + margin, 0.0)
    l = jnp.maximum(local_ap - local_an + margin, 0.0)
    if n_valid != Np:
        row_ids = row0 + lax.broadcasted_iota(jnp.int32, (TB, 1), 0)
        row_valid = (row_ids < n_valid).astype(jnp.float32)
        g = g * row_valid
        l = l * row_valid

    out_ref[0, 0] = jnp.sum(g)
    out_ref[0, 1] = jnp.sum(l)


def triplet_hard_loss_aligned_reid(inputs, targets, local_features,
                                   margin=0.3, block_rows=128):
    """Returns (global_loss, local_loss), matching the PyTorch module with
    metric='euclidean', mutual_flag=False.  Inputs may be bf16 or f32."""
    N, D = inputs.shape
    L = local_features.shape[1]

    # Row-block size: multiple of 8 sublanes; pad N up to a multiple of it.
    TB = min(_round_up(N, 8), _round_up(block_rows, 8))
    Np = _round_up(N, TB)
    pad = Np - N

    x = jnp.pad(inputs, ((0, pad), (0, 0))) if pad else inputs
    lf = jnp.pad(local_features, ((0, pad), (0, 0))) if pad else local_features
    t = targets.astype(jnp.int32)
    tp = jnp.pad(t, (0, pad)) if pad else t
    lab_row = tp.reshape(1, Np)
    lab_col = tp.reshape(Np, 1)

    num_blocks = Np // TB
    kernel = functools.partial(_triplet_kernel, margin=float(margin),
                               n_valid=N, block_rows=TB)

    partial_sums = pl.pallas_call(
        kernel,
        out_shape=jax.ShapeDtypeStruct((num_blocks, 2), jnp.float32),
        grid=(num_blocks,),
        in_specs=[
            pl.BlockSpec((Np, D), lambda i: (0, 0)),   # x, resident
            pl.BlockSpec((Np, L), lambda i: (0, 0)),   # local feats, resident
            pl.BlockSpec((1, Np), lambda i: (0, 0)),   # labels (row form)
            pl.BlockSpec((Np, 1), lambda i: (0, 0)),   # labels (col form)
        ],
        out_specs=pl.BlockSpec((1, 2), lambda i: (i, 0),
                               memory_space=pltpu.MemorySpace.SMEM),
        compiler_params=pltpu.CompilerParams(
            dimension_semantics=("parallel",)),
    )(x, lf, lab_row, lab_col)

    sums = jnp.sum(partial_sums, axis=0)
    return sums[0] / N, sums[1] / N


# ------------------------- pure-JAX reference (mirrors the PyTorch code) ----
def _euclidean_dist_ref(x, y):
    xx = jnp.sum(x * x, axis=1, keepdims=True)
    yy = jnp.sum(y * y, axis=1, keepdims=True).T
    d2 = xx + yy - 2.0 * (x @ y.T)
    return jnp.sqrt(jnp.maximum(d2, 1e-12))


def _reference(inputs, targets, local_features, margin=0.3):
    dist = _euclidean_dist_ref(inputs, inputs)
    is_pos = targets[:, None] == targets[None, :]
    masked_pos = jnp.where(is_pos, dist, -jnp.inf)
    masked_neg = jnp.where(is_pos, jnp.inf, dist)
    dist_ap = jnp.max(masked_pos, axis=1)
    dist_an = jnp.min(masked_neg, axis=1)
    p_inds = jnp.argmax(masked_pos, axis=1)
    n_inds = jnp.argmin(masked_neg, axis=1)
    lf = local_features
    lfp = lf[p_inds]
    lfn = lf[n_inds]
    local_ap = jnp.diag(_euclidean_dist_ref(lf, lfp))
    local_an = jnp.diag(_euclidean_dist_ref(lf, lfn))
    g = jnp.mean(jnp.maximum(dist_ap - dist_an + margin, 0.0))
    l = jnp.mean(jnp.maximum(local_ap - local_an + margin, 0.0))
    return g, l


def _check(inputs, targets, local_features, margin, block_rows=128):
    gloss, lloss = triplet_hard_loss_aligned_reid(
        inputs, targets, local_features, margin=margin, block_rows=block_rows)
    jax.block_until_ready((gloss, lloss))
    g_ref, l_ref = _reference(inputs.astype(jnp.float32), targets,
                              local_features.astype(jnp.float32), margin=margin)
    np.testing.assert_allclose(np.asarray(gloss), np.asarray(g_ref),
                               rtol=2e-3, atol=2e-4)
    np.testing.assert_allclose(np.asarray(lloss), np.asarray(l_ref),
                               rtol=2e-3, atol=2e-4)


if __name__ == "__main__":
    key = jax.random.PRNGKey(0)
    k1, k2, k3, k4 = jax.random.split(key, 4)

    # Test 1: aligned batch, bf16 features (bf16 MXU path), single block.
    N, D, L = 8, 32, 16          # 4 identities x 2 samples each
    inputs = jax.random.normal(k1, (N, D), dtype=jnp.float32).astype(jnp.bfloat16)
    local_features = jax.random.normal(k2, (N, L), dtype=jnp.float32).astype(jnp.bfloat16)
    targets = jnp.array([0, 0, 1, 1, 2, 2, 3, 3], dtype=jnp.int32)
    _check(inputs, targets, local_features, margin=0.3)

    # Test 2: non-aligned batch -> padding + valid masking + 2 row blocks.
    N2, D2, L2 = 12, 32, 16      # 4 identities x 3 samples each
    inputs2 = jax.random.normal(k3, (N2, D2), dtype=jnp.float32).astype(jnp.bfloat16)
    local2 = jax.random.normal(k4, (N2, L2), dtype=jnp.float32).astype(jnp.bfloat16)
    targets2 = jnp.array([0, 0, 0, 1, 1, 1, 2, 2, 2, 3, 3, 3], dtype=jnp.int32)
    _check(inputs2, targets2, local2, margin=0.3, block_rows=8)

    print("KERNEL_OK")
</pallas_src>

<mosaic_0001>
module attributes {stable_mosaic.version = 11 : i64} {
  func.func @_triplet_kernel(%arg0: i32, %arg1: memref<8x32xbf16, #tpu.memory_space<vmem>>, %arg2: memref<8x16xbf16, #tpu.memory_space<vmem>>, %arg3: memref<1x8xi32, #tpu.memory_space<vmem>>, %arg4: memref<8x1xi32, #tpu.memory_space<vmem>>, %arg5: memref<1x2xf32, #tpu.memory_space<smem>>) attributes {dimension_semantics = [#tpu.dimension_semantics<parallel>], iteration_bounds = array<i64: 1>, scalar_prefetch = 0 : i64, scratch_operands = 0 : i64, tpu.core_type = #tpu.core_type<tc>, window_params = [{pipeline_mode = #tpu.pipeline_mode<synchronous>, transform_indices = @transform_0, window_bounds = array<i64: 8, 32>}, {pipeline_mode = #tpu.pipeline_mode<synchronous>, transform_indices = @transform_1, window_bounds = array<i64: 8, 16>}, {pipeline_mode = #tpu.pipeline_mode<synchronous>, transform_indices = @transform_2, window_bounds = array<i64: 1, 8>}, {pipeline_mode = #tpu.pipeline_mode<synchronous>, transform_indices = @transform_3, window_bounds = array<i64: 8, 1>}, {transform_indices = @transform_4, window_bounds = array<i64: 1, 2>}]} {
    %c8_i32 = arith.constant 8 : i32
    %0 = arith.muli %arg0, %c8_i32 : i32
    %1 = tpu.assume_multiple %0, 8 : i32
    %c0 = arith.constant 0 : index
    %c0_0 = arith.constant 0 : index
    %2 = vector.load %arg1[%c0, %c0_0] : memref<8x32xbf16, #tpu.memory_space<vmem>>, vector<8x32xbf16>
    %c0_1 = arith.constant 0 : index
    %c0_2 = arith.constant 0 : index
    %3 = vector.load %arg2[%c0_1, %c0_2] : memref<8x16xbf16, #tpu.memory_space<vmem>>, vector<8x16xbf16>
    %c0_3 = arith.constant 0 : index
    %c0_4 = arith.constant 0 : index
    %4 = vector.load %arg3[%c0_3, %c0_4] : memref<1x8xi32, #tpu.memory_space<vmem>>, vector<1x8xi32>
    %5 = arith.index_cast %1 : i32 to index
    %c0_5 = arith.constant 0 : index
    %6 = vector.load %arg1[%5, %c0_5] : memref<8x32xbf16, #tpu.memory_space<vmem>>, vector<8x32xbf16>
    %7 = arith.index_cast %1 : i32 to index
    %c0_6 = arith.constant 0 : index
    %8 = vector.load %arg2[%7, %c0_6] : memref<8x16xbf16, #tpu.memory_space<vmem>>, vector<8x16xbf16>
    %9 = arith.index_cast %1 : i32 to index
    %c0_7 = arith.constant 0 : index
    %10 = vector.load %arg4[%9, %c0_7] : memref<8x1xi32, #tpu.memory_space<vmem>>, vector<8x1xi32>
    %cst = arith.constant dense<0.000000e+00> : vector<8x8xf32>
    %11 = tpu.matmul %6, %2, %cst {dimension_numbers = #tpu.dot_dimension_numbers<[1], [1], [0], [0], [0, 0, 1, 0], [], []>} : vector<8x32xbf16>, vector<8x32xbf16>, vector<8x8xf32> -> vector<8x8xf32>
    %12 = arith.extf %2 : vector<8x32xbf16> to vector<8x32xf32>
    %13 = arith.extf %6 : vector<8x32xbf16> to vector<8x32xf32>
    %14 = arith.mulf %13, %13 : vector<8x32xf32>
    %cst_8 = arith.constant dense<0.000000e+00> : vector<8xf32>
    %15 = vector.multi_reduction <add>, %14, %cst_8 [1] : vector<8x32xf32> to vector<8xf32>
    %16 = vector.shape_cast %15 : vector<8xf32> to vector<8x1xf32>
    %cst_9 = arith.constant 1.000000e+00 : f32
    %17 = vector.broadcast %cst_9 : f32 to vector<1x32xf32>
    %18 = arith.mulf %12, %12 : vector<8x32xf32>
    %cst_10 = arith.constant dense<0.000000e+00> : vector<1x8xf32>
    %19 = tpu.matmul %17, %18, %cst_10 {dimension_numbers = #tpu.dot_dimension_numbers<[1], [1], [0], [0], [0, 0, 1, 0], [], []>} : vector<1x32xf32>, vector<8x32xf32>, vector<1x8xf32> -> vector<1x8xf32>
    %20 = vector.broadcast %16 : vector<8x1xf32> to vector<8x8xf32>
    %21 = vector.broadcast %19 : vector<1x8xf32> to vector<8x8xf32>
    %22 = arith.addf %20, %21 : vector<8x8xf32>
    %cst_11 = arith.constant 2.000000e+00 : f32
    %23 = vector.broadcast %cst_11 : f32 to vector<8x8xf32>
    %24 = arith.mulf %23, %11 : vector<8x8xf32>
    %25 = arith.subf %22, %24 : vector<8x8xf32>
    %cst_12 = arith.constant 9.99999996E-13 : f32
    %26 = vector.broadcast %cst_12 : f32 to vector<8x8xf32>
    %27 = arith.maximumf %25, %26 : vector<8x8xf32>
    %28 = math.sqrt %27 : vector<8x8xf32>
    %29 = tpu.iota {dimensions = array<i32: 1>} : vector<8x8xi32>
    %30 = vector.broadcast %10 : vector<8x1xi32> to vector<8x8xi32>
    %31 = vector.broadcast %4 : vector<1x8xi32> to vector<8x8xi32>
    %32 = arith.cmpi eq, %30, %31 : vector<8x8xi32>
    %cst_13 = arith.constant 0xFF800000 : f32
    %33 = vector.broadcast %cst_13 : f32 to vector<8x8xf32>
    %34 = arith.select %32, %28, %33 : vector<8x8xi1>, vector<8x8xf32>
    %cst_14 = arith.constant 0x7F800000 : f32
    %35 = vector.broadcast %cst_14 : f32 to vector<8x8xf32>
    %36 = arith.select %32, %35, %28 : vector<8x8xi1>, vector<8x8xf32>
    %cst_15 = arith.constant dense<0xFF800000> : vector<8xf32>
    %37 = vector.multi_reduction <maximumf>, %34, %cst_15 [1] : vector<8x8xf32> to vector<8xf32>
    %38 = vector.shape_cast %37 : vector<8xf32> to vector<8x1xf32>
    %cst_16 = arith.constant dense<0x7F800000> : vector<8xf32>
    %39 = vector.multi_reduction <minimumf>, %36, %cst_16 [1] : vector<8x8xf32> to vector<8xf32>
    %40 = vector.shape_cast %39 : vector<8xf32> to vector<8x1xf32>
    %41 = vector.broadcast %38 : vector<8x1xf32> to vector<8x8xf32>
    %42 = arith.cmpf oeq, %34, %41 : vector<8x8xf32>
    %c8_i32_17 = arith.constant 8 : i32
    %43 = vector.broadcast %c8_i32_17 : i32 to vector<8x8xi32>
    %44 = arith.select %42, %29, %43 : vector<8x8xi1>, vector<8x8xi32>
    %cst_18 = arith.constant dense<2147483647> : vector<8xi32>
    %45 = vector.multi_reduction <minsi>, %44, %cst_18 [1] : vector<8x8xi32> to vector<8xi32>
    %46 = vector.shape_cast %45 : vector<8xi32> to vector<8x1xi32>
    %47 = vector.broadcast %40 : vector<8x1xf32> to vector<8x8xf32>
    %48 = arith.cmpf oeq, %36, %47 : vector<8x8xf32>
    %c8_i32_19 = arith.constant 8 : i32
    %49 = vector.broadcast %c8_i32_19 : i32 to vector<8x8xi32>
    %50 = arith.select %48, %29, %49 : vector<8x8xi1>, vector<8x8xi32>
    %cst_20 = arith.constant dense<2147483647> : vector<8xi32>
    %51 = vector.multi_reduction <minsi>, %50, %cst_20 [1] : vector<8x8xi32> to vector<8xi32>
    %52 = vector.shape_cast %51 : vector<8xi32> to vector<8x1xi32>
    %53 = tpu.concatenate %46, %52 in 0 : vector<8x1xi32>, vector<8x1xi32> -> vector<16x1xi32>
    %54 = tpu.iota {dimensions = array<i32: 1>} : vector<16x8xi32>
    %55 = vector.broadcast %53 : vector<16x1xi32> to vector<16x8xi32>
    %56 = arith.cmpi eq, %54, %55 : vector<16x8xi32>
    %57 = arith.extui %56 : vector<16x8xi1> to vector<16x8xi32>
    %58 = arith.sitofp %57 : vector<16x8xi32> to vector<16x8xf32>
    %59 = arith.truncf %58 : vector<16x8xf32> to vector<16x8xbf16>
    %cst_21 = arith.constant dense<0.000000e+00> : vector<16x16xf32>
    %60 = tpu.matmul %59, %3, %cst_21 {dimension_numbers = #tpu.dot_dimension_numbers<[1], [0], [0], [1], [0, 0, 1, 1], [], []>} : vector<16x8xbf16>, vector<8x16xbf16>, vector<16x16xf32> -> vector<16x16xf32>
    %61 = arith.extf %8 : vector<8x16xbf16> to vector<8x16xf32>
    %62 = vector.extract_strided_slice %60 {offsets = [0, 0], sizes = [8, 16], strides = [1, 1]} : vector<16x16xf32> to vector<8x16xf32>
    %63 = arith.subf %61, %62 : vector<8x16xf32>
    %64 = vector.extract_strided_slice %60 {offsets = [8, 0], sizes = [8, 16], strides = [1, 1]} : vector<16x16xf32> to vector<8x16xf32>
    %65 = arith.subf %61, %64 : vector<8x16xf32>
    %66 = arith.mulf %63, %63 : vector<8x16xf32>
    %cst_22 = arith.constant dense<0.000000e+00> : vector<8xf32>
    %67 = vector.multi_reduction <add>, %66, %cst_22 [1] : vector<8x16xf32> to vector<8xf32>
    %68 = vector.shape_cast %67 : vector<8xf32> to vector<8x1xf32>
    %cst_23 = arith.constant 9.99999996E-13 : f32
    %69 = vector.broadcast %cst_23 : f32 to vector<8x1xf32>
    %70 = arith.maximumf %68, %69 : vector<8x1xf32>
    %71 = math.sqrt %70 : vector<8x1xf32>
    %72 = arith.mulf %65, %65 : vector<8x16xf32>
    %cst_24 = arith.constant dense<0.000000e+00> : vector<8xf32>
    %73 = vector.multi_reduction <add>, %72, %cst_24 [1] : vector<8x16xf32> to vector<8xf32>
    %74 = vector.shape_cast %73 : vector<8xf32> to vector<8x1xf32>
    %cst_25 = arith.constant 9.99999996E-13 : f32
    %75 = vector.broadcast %cst_25 : f32 to vector<8x1xf32>
    %76 = arith.maximumf %74, %75 : vector<8x1xf32>
    %77 = math.sqrt %76 : vector<8x1xf32>
    %78 = arith.subf %38, %40 : vector<8x1xf32>
    %cst_26 = arith.constant 3.000000e-01 : f32
    %79 = vector.broadcast %cst_26 : f32 to vector<8x1xf32>
    %80 = arith.addf %78, %79 : vector<8x1xf32>
    %cst_27 = arith.constant 0.000000e+00 : f32
    %81 = vector.broadcast %cst_27 : f32 to vector<8x1xf32>
    %82 = arith.maximumf %80, %81 : vector<8x1xf32>
    %83 = arith.subf %71, %77 : vector<8x1xf32>
    %cst_28 = arith.constant 3.000000e-01 : f32
    %84 = vector.broadcast %cst_28 : f32 to vector<8x1xf32>
    %85 = arith.addf %83, %84 : vector<8x1xf32>
    %cst_29 = arith.constant 0.000000e+00 : f32
    %86 = vector.broadcast %cst_29 : f32 to vector<8x1xf32>
    %87 = arith.maximumf %85, %86 : vector<8x1xf32>
    %88 = vector.shape_cast %82 : vector<8x1xf32> to vector<1x8x1xf32>
    %cst_30 = arith.constant dense<0.000000e+00> : vector<1xf32>
    %89 = vector.multi_reduction <add>, %88, %cst_30 [1, 2] : vector<1x8x1xf32> to vector<1xf32>
    %90 = vector.shape_cast %89 : vector<1xf32> to vector<1x1x1xf32>
    %91 = vector.extract %90[0, 0, 0] : f32 from vector<1x1x1xf32>
    %c0_31 = arith.constant 0 : index
    %c0_32 = arith.constant 0 : index
    %92 = memref.load %arg5[%c0_31, %c0_32] : memref<1x2xf32, #tpu.memory_space<smem>>
    memref.store %91, %arg5[%c0_31, %c0_32] : memref<1x2xf32, #tpu.memory_space<smem>>
    %93 = vector.shape_cast %87 : vector<8x1xf32> to vector<1x8x1xf32>
    %cst_33 = arith.constant dense<0.000000e+00> : vector<1xf32>
    %94 = vector.multi_reduction <add>, %93, %cst_33 [1, 2] : vector<1x8x1xf32> to vector<1xf32>
    %95 = vector.shape_cast %94 : vector<1xf32> to vector<1x1x1xf32>
    %96 = vector.extract %95[0, 0, 0] : f32 from vector<1x1x1xf32>
    %c0_34 = arith.constant 0 : index
    %c1 = arith.constant 1 : index
    %97 = memref.load %arg5[%c0_34, %c1] : memref<1x2xf32, #tpu.memory_space<smem>>
    memref.store %96, %arg5[%c0_34, %c1] : memref<1x2xf32, #tpu.memory_space<smem>>
    return
  }
  func.func @transform_0(%arg0: i32) -> (i32, i32) {
    %c0_i32 = arith.constant 0 : i32
    %c0_i32_0 = arith.constant 0 : i32
    %c0_i32_1 = arith.constant 0 : i32
    return %c0_i32, %c0_i32_0 : i32, i32
  }
  func.func @transform_1(%arg0: i32) -> (i32, i32) {
    %c0_i32 = arith.constant 0 : i32
    %c0_i32_0 = arith.constant 0 : i32
    %c0_i32_1 = arith.constant 0 : i32
    return %c0_i32, %c0_i32_0 : i32, i32
  }
  func.func @transform_2(%arg0: i32) -> (i32, i32) {
    %c0_i32 = arith.constant 0 : i32
    %c0_i32_0 = arith.constant 0 : i32
    %c0_i32_1 = arith.constant 0 : i32
    return %c0_i32, %c0_i32_0 : i32, i32
  }
  func.func @transform_3(%arg0: i32) -> (i32, i32) {
    %c0_i32 = arith.constant 0 : i32
    %c0_i32_0 = arith.constant 0 : i32
    %c0_i32_1 = arith.constant 0 : i32
    return %c0_i32, %c0_i32_0 : i32, i32
  }
  func.func @transform_4(%arg0: i32) -> (i32, i32) {
    %c0_i32 = arith.constant 0 : i32
    %c0_i32_0 = arith.constant 0 : i32
    return %arg0, %c0_i32 : i32, i32
  }
}

</mosaic_0001>

<bundles_post_ra>
// kernel: tpu_custom_call.1
= control target key start
LH: loop header
LB: loop body
LE: loop exit
PB: predicated region body
PF: predicated region fallthrough
CT: control target
= control target key end

     0   :  { %vm33_vm0 = vcmask 261120   ;;  %v427_v1 = vmov 0.0   ;;  %vm428_vm1 = vmmov 0   ;;  %s510_s0 = inlined_call_operand.vmem [shape: bf16[8,32], index: 0, kind: input, shape index: {}]   ;;  %s511_s1 = inlined_call_operand.vmem [shape: bf16[8,16], index: 1, kind: input, shape index: {}]   ;;  %s512_s2 = inlined_call_operand.vmem [shape: s32[1,8], index: 2, kind: input, shape index: {}]   ;;  %s513_s3 = inlined_call_operand.vmem [shape: s32[8,1], index: 3, kind: input, shape index: {}]   ;;  %s514_s4 = inlined_call_operand.hbm [shape: f32[1,2], index: 4, kind: output, shape index: {}]  }
   0x1   :  { %v20_v0 = vld [vmem:[%s510_s0] sm:$0xf]  ;;  %381 = vmatprep.subr.bf16.mxu0 %v427_v1  ;;  %387 = vmatprep.subr.mxu1 %v427_v1 }
   0x2   :  { %v38_v2 = vsel %vm33_vm0, %v20_v0, 0  ;;  %v80_v3 = vunpack.c.l.bf16 %v20_v0  ;;  %v27_v4 = vld [vmem:[%s510_s0] sm:$0xf]  ;;  %389 = vmatprep.mubr.msk.f32.mxu1 %vm428_vm1, %v427_v1 }
   0x3   :  { %382 = vmatpush3.bf16.xpose.msra.mxu0 %v38_v2  ;;  %v81_v5 = vunpack.c.l.bf16 %v27_v4 }
   0x4   :  { %9 = vsyncpa [#allocation3], 0  ;;  %v86_v6 = vmul.f32 %v80_v3, %v80_v3  ;;  %383 = vmatprep.mubr.msk.bf16.mxu0 %vm428_vm1, %v427_v1  ;;  %v429_v7 = vmov 0   ;;  %v430_v10 = vmov 1.0   ;;  %v32_v11 = vld [vmem:[%s513_s3] sm:$0xff]  ;;  %v163_v12 = vlaneseq  ;;  %s415_s27 = scalar_lea.hbm %s514_s4, 16 }
   0x5   :  { %407 = vset.pattern.permute.xlu0 %v429_v7  ;;  %v82_v8 = vmul.f32 %v81_v5, %v81_v5  ;;  %408 = vset.pattern.permute.xlu1 %v429_v7  ;;  %v371_v28 = vld [vmem:[%s512_s2] ss:$0 sm:$0xff]  ;;  %vm190_vm5 = vcmask 64512   ;;  %vm247_vm10 = vcmask 1043456   ;;  %vm296_vm13 = vcmask 130048   ;;  %p416_p0 = scmp.ne.s32.totalorder %s514_s4, %s415_s27  ;;  %p419_p1 = scmp.lt.u32.totalorder %s415_s27, %s514_s4 }
   0x6   :  { %388 = vmatpush3.xpose.msk.msra.mxu1 %vm33_vm0, %v86_v6  ;;  %v164_v13 = vshrl.u32 %v163_v12, 7  ;;  %v179_v38 = vand.u32 127, %v163_v12  ;;  %vm326_vm14 = vcmask 7168  }
   0x7   :  { %v83_v9 = vsel %vm33_vm0, %v82_v8, 0.0  ;;  %392 = vmatprep.subr.bf16.mxu1 %v427_v1  ;;  %p421_p2 = pnand %p419_p1, %p416_p0 }
   0x8   :  { %84 = vadd.xlane.f32.xlu0 %v83_v9  ;;  %v165_v14 = vsub.s32 0, %v164_v13 }
   0x9   :  { %390 = vmatmul.mubr.msk.f32.vlgmr.msra.gmra.mrb[0].mxu1 %vm33_vm0, %v430_v10 }
   0xa   :  { %384 = vmatmul.mubr.msk.bf16.vlgmr.msra.gmra.mrb[0].mxu0 %vm33_vm0, %v27_v4  ;;  %394 = vmatprep.mubr.msk.bf16.mxu1 %vm428_vm1, %v427_v1  ;;  %v21_v4 = vld [vmem:[%s511_s1] sm:$0xf] }
   0xb   :  { %v249_v5 = vsel %vm247_vm10, %v21_v4, 0 }
   0xc   :  { %393 = vmatpush3.bf16.msra.mxu1 %v249_v5 }
  0x1e   :  { %181 = vperm.xlu0 %407, %v32_v11   ;;  %v30_v11 = vld [vmem:[%s511_s1] sm:$0xf] }
  0x1f   :  { %v292_v12 = vunpack.c.l.bf16 %v30_v11 }
  0x95   :  { %v85_v16 = vpop.xlane.xlu0 %84 }
  0x9d   :  { %v182_v27 = vpop.permute.xlu0 %181 }
  0x9e   :  { %vm187_vm2 = vcmp.eq.s32.totalorder %v182_v27, %v371_v28 }
  0xdc   :  { %v159_v15 = vpop.f32.mrb[0].mxu1 }
  0xdd   :  { %v166_v17 = vrot.slane %v159_v15, %v165_v14  ;;  %v74_v18 = vpop.f32.mrb[0].mxu0  ;;  %v391_v19 = vpop.f32.mrb[1].mxu1 }
  0xde   :  { %v168_v20 = vmul.f32 2.0, %v74_v18  ;;  %v385_v21 = vpop.f32.mrb[1].mxu0 }
  0xdf   :  { %v167_v22 = vadd.f32 %v166_v17, %v85_v16  ;;  %v77_v23 = vpop.f32.mrb[2].mxu0 }
  0xe0   :  { %v386_v24 = vpop.f32.mrb[3].mxu0 }
  0xe1   :  { %v169_v25 = vsub.f32 %v167_v22, %v168_v20 }
  0xe3   :  { %v170_v26 = vmax.f32 %v169_v25, 1e-12 }
  0xe5   :  { %409 = vrsqrt.f32 %v170_v26  ;;  %vm173_vm3 = vcmp.eq.f32.partialorder %v170_v26, inf  ;;  %v176_v31 = vand.u32 2147483648, %v170_v26  ;;  %vm175_vm4 = vcmp.eq.f32.partialorder %v170_v26, 0.0 }
  0xef   :  { %v410_v29 = vpop.eup %409 }
  0xf0   :  { %v172_v30 = vmul.f32 %v410_v29, %v170_v26 }
  0xf2   :  { %v174_v32 = vsel %vm173_vm3, %v170_v26, %v172_v30 }
  0xf3   :  { %v177_v33 = vsel %vm175_vm4, %v176_v31, %v174_v32 }
  0xf4   :  { %v188_v34 = vsel %vm187_vm2, %v177_v33, -inf  ;;  %v189_v36 = vsel %vm187_vm2, inf, %v177_v33 }
  0xf5   :  { %v191_v35 = vsel %vm190_vm5, %v188_v34, -inf  ;;  %v194_v37 = vsel %vm190_vm5, %v189_v36, inf }
  0xf6   :  { %192 = vmax.xlane.f32.xlu1 %v191_v35 }
  0xfa   :  { %195 = vmin.xlane.f32.xlu1 %v194_v37 }
 0x183   :  { %v193_v39 = vpop.xlane.xlu1 %192 }
 0x184   :  { %vm197_vm6 = vcmp.eq.f32.partialorder %v188_v34, %v193_v39 }
 0x185   :  { %v198_v40 = vsel %vm197_vm6, %v179_v38, 8 }
 0x186   :  { %v199_v41 = vsel %vm190_vm5, %v198_v40, 2147483647 }
 0x187   :  { %v196_v42 = vpop.xlane.xlu1 %195  ;;  %v201_v43 = vshra.s32 %v199_v41, 16  ;;  %v200_v49 = vand.u32 65535, %v199_v41 }
 0x188   :  { %vm214_vm7 = vcmp.eq.f32.partialorder %v189_v36, %v196_v42  ;;  %v320_v13 = vsub.f32 %v193_v39, %v196_v42 }
 0x189   :  { %v215_v44 = vsel %vm214_vm7, %v179_v38, 8  ;;  %v203_v45 = vcvt.s32.f32 %v201_v43  ;;  %v202_v51 = vcvt.s32.f32 %v200_v49 }
 0x18a   :  { %v216_v46 = vsel %vm190_vm5, %v215_v44, 2147483647  ;;  %v321_v18 = vadd.f32 0.3, %v320_v13 }
 0x18b   :  { %204 = vmin.xlane.f32.xlu1 %v203_v45  ;;  %v218_v47 = vshra.s32 %v216_v46, 16  ;;  %v217_v52 = vand.u32 65535, %v216_v46 }
 0x18c   :  { %v322_v24 = vmax.f32 %v321_v18, 0.0 }
 0x18d   :  { %v220_v48 = vcvt.s32.f32 %v218_v47  ;;  %v219_v55 = vcvt.s32.f32 %v217_v52 }
 0x18e   :  { %v327_v25 = vsel %vm326_vm14, %v322_v24, 0.0 }
 0x18f   :  { %221 = vmin.xlane.f32.xlu1 %v220_v48 }
 0x218   :  { %v205_v50 = vpop.xlane.xlu1 %204 }
 0x219   :  { %vm206_vm8 = vcmp.eq.f32.partialorder %v203_v45, %v205_v50  ;;  %v211_v57 = vcvt.f32.s32 %v205_v50 }
 0x21a   :  { %v207_v53 = vsel %vm206_vm8, %v202_v51, inf }
 0x21b   :  { %208 = vmin.xlane.f32.xlu1 %v207_v53  ;;  %v212_v59 = vshll.u32 %v211_v57, 16 }
 0x21c   :  { %v222_v54 = vpop.xlane.xlu1 %221 }
 0x21d   :  { %vm223_vm9 = vcmp.eq.f32.partialorder %v220_v48, %v222_v54  ;;  %v228_v60 = vcvt.f32.s32 %v222_v54 }
 0x21e   :  { %v224_v56 = vsel %vm223_vm9, %v219_v55, inf }
 0x21f   :  { %225 = vmin.xlane.f32.xlu1 %v224_v56  ;;  %v229_v0 = vshll.u32 %v228_v60, 16 }
 0x2a8   :  { %v209_v58 = vpop.xlane.xlu1 %208 }
 0x2a9   :  { %v210_v61 = vcvt.f32.s32 %v209_v58 }
 0x2ab   :  { %v213_v62 = vadd.s32 %v212_v59, %v210_v61 }
 0x2ac   :  { %v226_v63 = vpop.xlane.xlu1 %225 }
 0x2ad   :  { %v227_v2 = vcvt.f32.s32 %v226_v63  ;;  %232 = vperm.xlu1 %408, %v213_v62  }
 0x2af   :  { %v230_v3 = vadd.s32 %v229_v0, %v227_v2 }
 0x2b1   :  { %235 = vperm.xlu1 %408, %v230_v3  }
 0x32c   :  { %v233_v6 = vpop.permute.xlu1 %232 }
 0x32d   :  { %vm237_vm11 = vcmp.eq.s32.totalorder %v179_v38, %v233_v6 }
 0x32e   :  { %v372_v8 = vsel %vm237_vm11, 1.0, %v427_v1 }
 0x330   :  { %v236_v7 = vpop.permute.xlu1 %235 }
 0x331   :  { %vm238_vm12 = vcmp.eq.s32.totalorder %v179_v38, %v236_v7 }
 0x332   :  { %v373_v9 = vsel %vm238_vm12, 1.0, %v427_v1 }
 0x333   :  { %v243_v10 = vpack.c.bf16 %v373_v9, %v372_v8 }
 0x335   :  { %395 = vmatmul.mubr.msk.bf16.vlgmr.msra.gmra.mrb[4].mxu1 %vm190_vm5, %v243_v10 }
 0x408   :  { %v285_v14 = vpop.f32.mrb[4].mxu1 }
 0x409   :  { %v293_v15 = vsub.f32 %v292_v12, %v285_v14  ;;  %v396_v16 = vpop.f32.mrb[5].mxu1 }
 0x40a   :  { %v288_v17 = vpop.f32.mrb[6].mxu1 }
 0x40b   :  { %v295_v19 = vmul.f32 %v293_v15, %v293_v15  ;;  %v294_v20 = vsub.f32 %v292_v12, %v288_v17  ;;  %v397_v21 = vpop.f32.mrb[7].mxu1 }
 0x40d   :  { %v308_v22 = vmul.f32 %v294_v20, %v294_v20  ;;  %v297_v1 = vsel %vm296_vm13, %v295_v19, 0.0 }
 0x40e   :  { %298 = vadd.xlane.f32.xlu1 %v297_v1 }
 0x40f   :  { %v309_v23 = vsel %vm296_vm13, %v308_v22, 0.0 }
 0x410   :  { %310 = vadd.xlane.f32.xlu0 %v309_v23 }
 0x414   :  { %328 = vadd.xlane.f32.xlu0 %v327_v25 }
 0x49b   :  { %v299_v26 = vpop.xlane.xlu1 %298 }
 0x49c   :  { %v300_v27 = vmax.f32 %v299_v26, 1e-12 }
 0x49d   :  { %v311_v28 = vpop.xlane.xlu0 %310 }
 0x49e   :  { %411 = vrsqrt.f32 %v300_v27  ;;  %v312_v29 = vmax.f32 %v311_v28, 1e-12  ;;  %vm303_vm15 = vcmp.eq.f32.partialorder %v300_v27, inf  ;;  %v306_v42 = vand.u32 2147483648, %v300_v27 }
 0x49f   :  { %vm305_vm1 = vcmp.eq.f32.partialorder %v300_v27, 0.0 }
 0x4a0   :  { %413 = vrsqrt.f32 %v312_v29  ;;  %vm315_vm0 = vcmp.eq.f32.partialorder %v312_v29, inf  ;;  %v318_v43 = vand.u32 2147483648, %v312_v29  ;;  %vm317_vm2 = vcmp.eq.f32.partialorder %v312_v29, 0.0 }
 0x4a1   :  { %v329_v30 = vpop.xlane.xlu0 %328 }
 0x4a2   :  { %v330_v31 = vrot.slane %v329_v30, 4 }
 0x4a4   :  { %v331_v32 = vadd.f32 %v330_v31, %v329_v30 }
 0x4a6   :  { %v332_v33 = vrot.slane %v331_v32, 2 }
 0x4a8   :  { %v412_v34 = vpop.eup %411  ;;  %v333_v35 = vadd.f32 %v332_v33, %v331_v32 }
 0x4a9   :  { %v302_v36 = vmul.f32 %v412_v34, %v300_v27 }
 0x4aa   :  { %v414_v37 = vpop.eup %413  ;;  %v334_v38 = vrot.slane %v333_v35, 1 }
 0x4ab   :  { %v304_v39 = vsel %vm303_vm15, %v300_v27, %v302_v36  ;;  %v314_v40 = vmul.f32 %v414_v37, %v312_v29 }
 0x4ac   :  { %v335_v41 = vadd.f32 %v334_v38, %v333_v35  ;;  %v307_v45 = vsel %vm305_vm1, %v306_v42, %v304_v39 }
 0x4ad   :  { %v316_v44 = vsel %vm315_vm0, %v312_v29, %v314_v40 }
 0x4ae   :  { %398 = vpush %v335_v41  ;;  %v319_v46 = vsel %vm317_vm2, %v318_v43, %v316_v44 }
 0x4af   :  { %v323_v47 = vsub.f32 %v307_v45, %v319_v46 }
 0x4b1   :  { %v324_v48 = vadd.f32 0.3, %v323_v47 }
 0x4b3   :  { %v325_v49 = vmax.f32 %v324_v48, 0.0 }
 0x4b5   :  { %v339_v50 = vsel %vm326_vm14, %v325_v49, 0.0 }
 0x4b6   :  { %340 = vadd.xlane.f32.xlu1 %v339_v50 }
 0x4df   :  { %s399_s1 = spop %398 }
 0x4e0   :  { %338 = sst [smem:[#allocation2]] %s399_s1 }
 0x543   :  { %v341_v51 = vpop.xlane.xlu1 %340 }
 0x544   :  { %v342_v52 = vrot.slane %v341_v51, 4 }
 0x546   :  { %v343_v53 = vadd.f32 %v342_v52, %v341_v51 }
 0x548   :  { %v344_v54 = vrot.slane %v343_v53, 2 }
 0x54a   :  { %v345_v55 = vadd.f32 %v344_v54, %v343_v53 }
 0x54c   :  { %v346_v56 = vrot.slane %v345_v55, 1 }
 0x54e   :  { %v347_v57 = vadd.f32 %v346_v56, %v345_v55 }
 0x550   :  { %400 = vpush %v347_v57 }
 0x581   :  { %s401_s24 = spop %400 }
 0x582   :  { %350 = sst [smem:[#allocation2 + $0x1]] %s401_s24 }
 0x583   :  { %424 = shalt.err (!%p421_p2)
}
 0x584   :  { %s431_s6 = smov [#allocation2]  }
 0x585   :  { %358 = dma.smem_to_hbm %s431_s6, 16, %s514_s4, [#allocation3]  }
 0x586   :  { %425 = dma.done.wait [#allocation3], 16  }
 0x587   :  { %426 = vsyncadd [#allocation3], 4294967280 }
 0x588   :  { %362 = sfence }
 0x589   :  { %363 = vsyncpa [#allocation3], 1 }

</bundles_post_ra>
